<compile_context>
chip_gen: v7x
topology: tpu7x:2x2x1
jax: 0.10.0
libtpu: 0.0.40
codegen_flags: <defaults>
</compile_context>

<pallas_src>
import math

import jax
import jax.numpy as jnp
from jax.experimental import pallas as pl
from jax.experimental.pallas import tpu as pltpu

HIDDEN = 128  # fixed by the PyTorch module


def _round_up(x: int, m: int) -> int:
    return ((x + m - 1) // m) * m


def _whole_spec(shape):
    """Full-array BlockSpec (rank bound via closure, works for any grid)."""
    rank = len(shape)
    return pl.BlockSpec(shape, lambda *_: (0,) * rank)


# ----------------------------------------------------------------------------
# Prep kernel: fold factorized noise into one effective weight + bias per
# noisy layer.  Runs once per noise draw, NOT per forward.
# ----------------------------------------------------------------------------
def _fuse_noisy_layer_kernel(w_mu_ref, w_sig_ref, b_mu_ref, b_sig_ref,
                             eps_in_ref, eps_out_ref, w_ref, b_ref):
    eps_out = eps_out_ref[...]                              # [1, out]
    eps = eps_in_ref[...] * eps_out                         # outer product [in, out]
    w_ref[...] = w_mu_ref[...] + w_sig_ref[...] * eps
    b_ref[...] = b_mu_ref[...] + b_sig_ref[...] * eps_out


def fuse_noisy_layer(w_mu, w_sigma, b_mu, b_sigma, eps_in, eps_out):
    in_f, out_f = w_mu.shape
    f32 = jnp.float32
    args = (
        w_mu.astype(f32),
        w_sigma.astype(f32),
        b_mu.reshape(1, out_f).astype(f32),
        b_sigma.reshape(1, out_f).astype(f32),
        eps_in.reshape(in_f, 1).astype(f32),
        eps_out.reshape(1, out_f).astype(f32),
    )
    return pl.pallas_call(
        _fuse_noisy_layer_kernel,
        out_shape=(jax.ShapeDtypeStruct((in_f, out_f), f32),
                   jax.ShapeDtypeStruct((1, out_f), f32)),
        grid=(),
        in_specs=[_whole_spec(a.shape) for a in args],
        out_specs=(_whole_spec((in_f, out_f)), _whole_spec((1, out_f))),
    )(*args)


# ----------------------------------------------------------------------------
# Main fused forward kernel: 3 matmuls + 2 ReLUs on one batch tile.
# Weights/biases are VMEM-resident across the batch grid (constant index_map).
# ----------------------------------------------------------------------------
def _noisy_mlp_kernel(x_ref, w1_ref, b1_ref, w2_ref, b2_ref, w3_ref, b3_ref, o_ref):
    x = x_ref[...]

    h1 = jnp.dot(x, w1_ref[...], preferred_element_type=jnp.float32) + b1_ref[...]
    h1 = jnp.maximum(h1, 0.0)

    h2 = jnp.dot(h1, w2_ref[...], preferred_element_type=jnp.float32) + b2_ref[...]
    h2 = jnp.maximum(h2, 0.0)

    o_ref[...] = (
        jnp.dot(h2, w3_ref[...], preferred_element_type=jnp.float32) + b3_ref[...]
    )


def noisy_network_forward(x, eff, *, block_m=256):
    """x: [B, in_dim] float32; eff: output of prepare_inference_params."""
    B, in_dim = x.shape
    assert in_dim == eff["in_dim"], "input feature dim mismatch"
    in_pad, out_pad, out_dim = eff["in_pad"], eff["out_pad"], eff["out_dim"]

    # Batch tile: 256 feeds the 256-wide MXU on v6e/v7x; for tiny batches just
    # round up to a sublane multiple so there is a single grid step.
    tm = block_m if B >= block_m else _round_up(max(B, 1), 8)
    b_pad = _round_up(B, tm)

    # Lane/K padding (zeros), sliced off on the way out.
    x_p = jnp.zeros((b_pad, in_pad), jnp.float32).at[:B, :in_dim].set(x)

    tile_map = lambda i: (i, 0)    # x / o: step along the batch axis
    const_map = lambda i: (0, 0)   # weights/biases: resident across the grid

    in_specs = [
        pl.BlockSpec((tm, in_pad), tile_map),
        pl.BlockSpec((in_pad, HIDDEN), const_map),
        pl.BlockSpec((1, HIDDEN), const_map),
        pl.BlockSpec((HIDDEN, HIDDEN), const_map),
        pl.BlockSpec((1, HIDDEN), const_map),
        pl.BlockSpec((HIDDEN, out_pad), const_map),
        pl.BlockSpec((1, out_pad), const_map),
    ]
    out_spec = pl.BlockSpec((tm, out_pad), tile_map)

    out = pl.pallas_call(
        _noisy_mlp_kernel,
        out_shape=jax.ShapeDtypeStruct((b_pad, out_pad), jnp.float32),
        grid=(b_pad // tm,),
        in_specs=in_specs,
        out_specs=out_spec,
        compiler_params=pltpu.CompilerParams(
            dimension_semantics=("parallel",),  # shard batch across TCs on v7x
        ),
    )(x_p, eff["w1"], eff["b1"], eff["w2"], eff["b2"], eff["w3"], eff["b3"])

    return out[:B, :out_dim]


# ----------------------------------------------------------------------------
# Parameter init mirroring the PyTorch module (stored transposed: [in, out]).
# Noise is kept factorized (eps_in / eps_out vectors, like the torch source
# vectors) and folded into effective weights once per noise draw.
# ----------------------------------------------------------------------------
def scale_noise(key, size):
    x = jax.random.normal(key, (size,), dtype=jnp.float32)
    return jnp.sign(x) * jnp.sqrt(jnp.abs(x))


def init_noisy_linear(key, in_features, out_features, std_init=0.5):
    k_mu_w, k_mu_b, k_eps_in, k_eps_out = jax.random.split(key, 4)
    mu_range = 1.0 / math.sqrt(in_features)
    return dict(
        w_mu=jax.random.uniform(
            k_mu_w, (in_features, out_features), jnp.float32, -mu_range, mu_range),
        w_sigma=jnp.full(
            (in_features, out_features), std_init / math.sqrt(in_features), jnp.float32),
        b_mu=jax.random.uniform(
            k_mu_b, (out_features,), jnp.float32, -mu_range, mu_range),
        b_sigma=jnp.full(
            (out_features,), std_init / math.sqrt(out_features), jnp.float32),
        eps_in=scale_noise(k_eps_in, in_features),
        eps_out=scale_noise(k_eps_out, out_features),
    )


def init_params(key, in_dim, out_dim):
    k_feat_w, k_feat_b, k_n1, k_n2 = jax.random.split(key, 4)
    bound1 = 1.0 / math.sqrt(in_dim)
    n1 = init_noisy_linear(k_n1, HIDDEN, HIDDEN)
    n2 = init_noisy_linear(k_n2, HIDDEN, out_dim)
    return dict(
        in_dim=in_dim, out_dim=out_dim,
        w1=jax.random.uniform(k_feat_w, (in_dim, HIDDEN), jnp.float32, -bound1, bound1),
        b1=jax.random.uniform(k_feat_b, (HIDDEN,), jnp.float32, -bound1, bound1),
        n1=n1, n2=n2,
    )


def prepare_inference_params(p):
    """Pad to lane-friendly shapes and fold noise into effective weights.

    Call once per noise draw (the analogue of reset_noise()); the per-forward
    kernel then sees one dense weight + bias per layer.
    """
    in_dim, out_dim = p["in_dim"], p["out_dim"]
    in_pad = _round_up(in_dim, 128)
    out_pad = _round_up(out_dim, 128)
    f32 = jnp.float32

    # Feature layer: zero-pad the contraction dim to 128 lanes (exact result).
    w1 = jnp.zeros((in_pad, HIDDEN), f32).at[:in_dim, :].set(p["w1"])
    b1 = p["b1"].reshape(1, HIDDEN)

    # Noisy layer 1 (128 -> 128): fuse on-device from factorized noise.
    n1 = p["n1"]
    w2, b2 = fuse_noisy_layer(
        n1["w_mu"], n1["w_sigma"], n1["b_mu"], n1["b_sigma"],
        n1["eps_in"], n1["eps_out"])

    # Noisy layer 2 (128 -> out_dim): zero-pad the output lanes to 128 before
    # fusion (padded mu/sigma/eps/bias are zero, so padded outputs are zero).
    n2 = p["n2"]
    w3_mu = jnp.zeros((HIDDEN, out_pad), f32).at[:, :out_dim].set(n2["w_mu"])
    w3_sig = jnp.zeros((HIDDEN, out_pad), f32).at[:, :out_dim].set(n2["w_sigma"])
    b3_mu = jnp.zeros((out_pad,), f32).at[:out_dim].set(n2["b_mu"])
    b3_sig = jnp.zeros((out_pad,), f32).at[:out_dim].set(n2["b_sigma"])
    eps3_out = jnp.zeros((out_pad,), f32).at[:out_dim].set(n2["eps_out"])
    w3, b3 = fuse_noisy_layer(w3_mu, w3_sig, b3_mu, b3_sig, n2["eps_in"], eps3_out)

    return dict(w1=w1, b1=b1, w2=w2, b2=b2, w3=w3, b3=b3,
                in_dim=in_dim, out_dim=out_dim, in_pad=in_pad, out_pad=out_pad)


# ----------------------------------------------------------------------------
# Pure-JAX reference (un-padded, logical params) for correctness checking.
# ----------------------------------------------------------------------------
def reference_forward(x, p):
    h1 = jnp.maximum(x @ p["w1"] + p["b1"], 0.0)
    n1, n2 = p["n1"], p["n2"]
    w2 = n1["w_mu"] + n1["w_sigma"] * jnp.outer(n1["eps_in"], n1["eps_out"])
    b2 = n1["b_mu"] + n1["b_sigma"] * n1["eps_out"]
    h2 = jnp.maximum(h1 @ w2 + b2, 0.0)
    w3 = n2["w_mu"] + n2["w_sigma"] * jnp.outer(n2["eps_in"], n2["eps_out"])
    b3 = n2["b_mu"] + n2["b_sigma"] * n2["eps_out"]
    return h2 @ w3 + b3


if __name__ == "__main__":
    key = jax.random.PRNGKey(0)
    k_param, k_x1, k_x2 = jax.random.split(key, 3)

    in_dim, out_dim = 32, 8
    params = init_params(k_param, in_dim, out_dim)
    eff = prepare_inference_params(params)   # once per noise draw

    # TODO(synk): bf16 matmul inputs (f32 accumulation) would halve weight /
    # activation DMA bytes on v6e/v7x; kept f32 here to match the f32 reference.

    ok = True
    # Small batch (single grid step) and a larger ragged batch that exercises
    # the batch grid + padding path (300 -> 2 tiles of 256).
    for k_x, batch in ((k_x1, 8), (k_x2, 300)):
        x = jax.random.normal(k_x, (batch, in_dim), dtype=jnp.float32)
        out = jax.block_until_ready(noisy_network_forward(x, eff))
        ref = reference_forward(x, params)
        ok &= out.shape == (batch, out_dim)
        ok &= bool(jnp.allclose(out, ref, atol=1e-4, rtol=1e-4))

    assert ok, "kernel/reference mismatch"
    print("KERNEL_OK")
</pallas_src>

<mosaic_0001>
module attributes {stable_mosaic.version = 11 : i64} {
  func.func @_fuse_noisy_layer_kernel(%arg0: memref<128x128xf32, #tpu.memory_space<vmem>>, %arg1: memref<128x128xf32, #tpu.memory_space<vmem>>, %arg2: memref<1x128xf32, #tpu.memory_space<vmem>>, %arg3: memref<1x128xf32, #tpu.memory_space<vmem>>, %arg4: memref<128x1xf32, #tpu.memory_space<vmem>>, %arg5: memref<1x128xf32, #tpu.memory_space<vmem>>, %arg6: memref<128x128xf32, #tpu.memory_space<vmem>>, %arg7: memref<1x128xf32, #tpu.memory_space<vmem>>) attributes {dimension_semantics = [], scalar_prefetch = 0 : i64, scratch_operands = 0 : i64, tpu.core_type = #tpu.core_type<tc>} {
    %c0 = arith.constant 0 : index
    %c0_0 = arith.constant 0 : index
    %0 = vector.load %arg5[%c0, %c0_0] : memref<1x128xf32, #tpu.memory_space<vmem>>, vector<1x128xf32>
    %c0_1 = arith.constant 0 : index
    %c0_2 = arith.constant 0 : index
    %1 = vector.load %arg4[%c0_1, %c0_2] : memref<128x1xf32, #tpu.memory_space<vmem>>, vector<128x1xf32>
    %2 = vector.broadcast %1 : vector<128x1xf32> to vector<128x128xf32>
    %3 = vector.broadcast %0 : vector<1x128xf32> to vector<128x128xf32>
    %4 = arith.mulf %2, %3 : vector<128x128xf32>
    %c0_3 = arith.constant 0 : index
    %c0_4 = arith.constant 0 : index
    %5 = vector.load %arg0[%c0_3, %c0_4] : memref<128x128xf32, #tpu.memory_space<vmem>>, vector<128x128xf32>
    %c0_5 = arith.constant 0 : index
    %c0_6 = arith.constant 0 : index
    %6 = vector.load %arg1[%c0_5, %c0_6] : memref<128x128xf32, #tpu.memory_space<vmem>>, vector<128x128xf32>
    %7 = arith.mulf %6, %4 : vector<128x128xf32>
    %8 = arith.addf %5, %7 : vector<128x128xf32>
    %c0_7 = arith.constant 0 : index
    %c0_8 = arith.constant 0 : index
    %9 = vector.load %arg6[%c0_7, %c0_8] : memref<128x128xf32, #tpu.memory_space<vmem>>, vector<128x128xf32>
    tpu.vector_store %arg6[%c0_7, %c0_8], %8 {strides = array<i32>} : memref<128x128xf32, #tpu.memory_space<vmem>>, vector<128x128xf32>,
    %c0_9 = arith.constant 0 : index
    %c0_10 = arith.constant 0 : index
    %10 = vector.load %arg2[%c0_9, %c0_10] : memref<1x128xf32, #tpu.memory_space<vmem>>, vector<1x128xf32>
    %c0_11 = arith.constant 0 : index
    %c0_12 = arith.constant 0 : index
    %11 = vector.load %arg3[%c0_11, %c0_12] : memref<1x128xf32, #tpu.memory_space<vmem>>, vector<1x128xf32>
    %12 = arith.mulf %11, %0 : vector<1x128xf32>
    %13 = arith.addf %10, %12 : vector<1x128xf32>
    %c0_13 = arith.constant 0 : index
    %c0_14 = arith.constant 0 : index
    %14 = vector.load %arg7[%c0_13, %c0_14] : memref<1x128xf32, #tpu.memory_space<vmem>>, vector<1x128xf32>
    tpu.vector_store %arg7[%c0_13, %c0_14], %13 {strides = array<i32>} : memref<1x128xf32, #tpu.memory_space<vmem>>, vector<1x128xf32>,
    return
  }
}

</mosaic_0001>

<bundles_post_ra>
// kernel: tpu_custom_call.1
= control target key start
LH: loop header
LB: loop body
LE: loop exit
PB: predicated region body
PF: predicated region fallthrough
CT: control target
= control target key end

     0   :  { %13 = vsyncpa [#allocation3], 0  ;;  %s567_s0 = inlined_call_operand.vmem [shape: f32[128,128], index: 0, kind: input, shape index: {}]   ;;  %s568_s1 = inlined_call_operand.hbm [shape: f32[128,128], index: 1, kind: input, shape index: {}]   ;;  %s569_s2 = inlined_call_operand.vmem [shape: f32[1,128], index: 2, kind: input, shape index: {}]   ;;  %s570_s3 = inlined_call_operand.vmem [shape: f32[1,128], index: 3, kind: input, shape index: {}]   ;;  %s571_s4 = inlined_call_operand.vmem [shape: f32[128,1], index: 4, kind: input, shape index: {}]   ;;  %s572_s5 = inlined_call_operand.vmem [shape: f32[1,128], index: 5, kind: input, shape index: {}]   ;;  %s573_s6 = inlined_call_operand.hbm [shape: f32[128,128], index: 6, kind: output, shape index: {0}]   ;;  %s574_s7 = inlined_call_operand.hbm [shape: f32[1,128], index: 7, kind: output, shape index: {1}]  }
   0x1   :  { %14 = vsyncpa [#allocation4], 0 }
   0x2   :  { %15 = vsyncpa [#allocation7], 0  ;;  %s356_s24 = smov [#allocation2]   ;;  %s284_s28 = scalar_lea.hbm %s568_s1, 2048 }
   0x3   :  { %s23_s25 = sshll.u32 %s356_s24, 4  ;;  %p285_p0 = scmp.ne.s32.totalorder %s568_s1, %s284_s28  ;;  %s24_s25 = int_to_ptr.vmem [resolvable:$true] %s23_s25 }
   0x4   :  { %p288_p1 = scmp.lt.u32.totalorder %s284_s28, %s568_s1 }
   0x6   :  { %p290_p2 = pnand %p288_p1, %p285_p0 }
   0x8   :  { %293 = shalt.err (!%p290_p2)
}
   0x9   :  { %s294_s10 = scalar_lea.vmem %s24_s25, 2048  ;;  %p299_p4 = scmp.lt.s32.totalorder %s24_s25, %s24_s25 }
   0xa   :  { %p295_p3 = scmp.ne.s32.totalorder %s24_s25, %s294_s10  ;;  %p300_p5 = scmp.lt.s32.totalorder %s294_s10, %s294_s10 }
   0xc   :  { %p301_p6 = por %p300_p5, %p299_p4 }
   0xe   :  { %p302_p7 = pnand %p301_p6, %p295_p3 }
  0x10   :  { %305 = shalt.err (!%p302_p7)
}
  0x11   :  { %s357_s11 = smov 128   ;;  %s358_s12 = smov 8  }
  0x12   :  { %29 = dma.hbm_to_vmem [thread:$0]  %s568_s1, 2048, %s24_s25, [#allocation3], %s357_s11, %s357_s11, %s358_s12  }
  0x13   :  { %350 = dma.done.wait [#allocation3], 2048  }
  0x14   :  { %351 = vsyncadd [#allocation3], 4294965248  ;;  %v359_v0 = vmov 0   ;;  %v44_v1 = vld [vmem:[%s571_s4 + $0x10] sm:$0xff]  ;;  %v42_v2 = vld [vmem:[%s571_s4] sm:$0xff]  ;;  %s360_s30 = smov [#allocation6]  }
  0x15   :  { %283 = vset.pattern.permute.xlu1 %v359_v0  ;;  %282 = vset.pattern.permute.xlu0 %v359_v0  ;;  %v45_v3 = vld [vmem:[%s571_s4 + $0x18] sm:$0xff]  ;;  %v43_v4 = vld [vmem:[%s571_s4 + $0x8] sm:$0xff]  ;;  %v46_v6 = vld [vmem:[%s571_s4 + $0x20] sm:$0xff]  ;;  %s263_s8 = sshll.u32 %s360_s30, 4  ;;  %s264_s8 = int_to_ptr.vmem [resolvable:$true] %s263_s8 }
  0x16   :  { %70 = vperm.xlu1 %283, %v44_v1   ;;  %60 = vperm.xlu0 %282, %v42_v2   ;;  %v47_v5 = vld [vmem:[%s571_s4 + $0x28] sm:$0xff]  ;;  %v49_v7 = vld [vmem:[%s571_s4 + $0x38] sm:$0xff]  ;;  %v48_v8 = vld [vmem:[%s571_s4 + $0x30] sm:$0xff]  ;;  %s310_s9 = scalar_lea.vmem %s264_s8, 32  ;;  %p311_p9 = scmp.lt.s32.totalorder %s264_s8, %s264_s8 }
  0x17   :  { %v51_v9 = vld [vmem:[%s571_s4 + $0x48] sm:$0xff]  ;;  %v50_v10 = vld [vmem:[%s571_s4 + $0x40] sm:$0xff]  ;;  %v53_v11 = vld [vmem:[%s571_s4 + $0x58] sm:$0xff] }
  0x18   :  { %v52_v12 = vld [vmem:[%s571_s4 + $0x50] sm:$0xff]  ;;  %v55_v13 = vld [vmem:[%s571_s4 + $0x68] sm:$0xff]  ;;  %v54_v14 = vld [vmem:[%s571_s4 + $0x60] sm:$0xff] }
  0x19   :  { %v57_v15 = vld [vmem:[%s571_s4 + $0x78] sm:$0xff]  ;;  %v56_v16 = vld [vmem:[%s571_s4 + $0x70] sm:$0xff]  ;;  %v41_v17 = vld [vmem:[%s572_s5] sm:$0x1]  ;;  %s306_s4 = scalar_lea.vmem %s264_s8, 16 }
  0x1a   :  { %75 = vperm.xlu1 %283, %v45_v3   ;;  %65 = vperm.xlu0 %282, %v43_v4   ;;  %v241_v18 = vld [vmem:[%s570_s3] sm:$0x1]  ;;  %p307_p8 = scmp.ne.s32.totalorder %s264_s8, %s306_s4  ;;  %p312_p10 = scmp.lt.s32.totalorder %s310_s9, %s306_s4 }
  0x1b   :  { %v242_v19 = vmul.f32 %v241_v18, %v41_v17  ;;  %v240_v20 = vld [vmem:[%s569_s2] sm:$0x1] }
  0x1c   :  { %p313_p11 = por %p312_p10, %p311_p9 }
  0x1d   :  { %v243_v21 = vadd.f32 %v242_v19, %v240_v20 }
  0x1e   :  { %85 = vperm.xlu1 %283, %v47_v5   ;;  %80 = vperm.xlu0 %282, %v46_v6   ;;  %p314_p12 = pnand %p313_p11, %p307_p8 }
  0x1f   :  { %244 = vst [vmem:[#allocation6] sm:$0x1] %v243_v21 }
  0x22   :  { %95 = vperm.xlu1 %283, %v49_v7   ;;  %90 = vperm.xlu0 %282, %v48_v8  }
  0x26   :  { %105 = vperm.xlu1 %283, %v51_v9   ;;  %100 = vperm.xlu0 %282, %v50_v10  }
  0x2a   :  { %115 = vperm.xlu1 %283, %v53_v11   ;;  %110 = vperm.xlu0 %282, %v52_v12  }
  0x2e   :  { %125 = vperm.xlu1 %283, %v55_v13   ;;  %120 = vperm.xlu0 %282, %v54_v14  }
  0x32   :  { %135 = vperm.xlu1 %283, %v57_v15   ;;  %130 = vperm.xlu0 %282, %v56_v16  }
  0x33   :  { %317 = shalt.err (!%p314_p12)
}
  0x34   :  { %s318_s10 = scalar_lea.hbm %s574_s7, 16 }
  0x35   :  { %p319_p13 = scmp.ne.s32.totalorder %s574_s7, %s318_s10  ;;  %p322_p0 = scmp.lt.u32.totalorder %s318_s10, %s574_s7 }
  0x37   :  { %p324_p1 = pnand %p322_p0, %p319_p13 }
  0x39   :  { %327 = shalt.err (!%p324_p1)
}
  0x3a   :  { %266 = dma.vmem_to_hbm [thread:$0]  %s264_s8, 16, %s574_s7, [#allocation7]   ;;  %v139_v22 = vlaneseq  ;;  %v178_v26 = vld [vmem:[#allocation2 + $0x10] sm:$0xff]  ;;  %v176_v28 = vld [vmem:[#allocation2] sm:$0xff]  ;;  %v179_v36 = vld [vmem:[#allocation2 + $0x18] sm:$0xff] }
  0x3b   :  { %v162_v32 = vld [vmem:[%s567_s0 + $0x10] sm:$0xff]  ;;  %v160_v33 = vld [vmem:[%s567_s0] sm:$0xff]  ;;  %v177_v38 = vld [vmem:[#allocation2 + $0x8] sm:$0xff]  ;;  %s361_s21 = smov [#allocation5]  }
  0x3c   :  { %v140_v23 = vshrl.u32 %v139_v22, 7  ;;  %v163_v44 = vld [vmem:[%s567_s0 + $0x18] sm:$0xff]  ;;  %v161_v45 = vld [vmem:[%s567_s0 + $0x8] sm:$0xff]  ;;  %v180_v50 = vld [vmem:[#allocation2 + $0x20] sm:$0xff]  ;;  %s250_s22 = sshll.u32 %s361_s21, 4  ;;  %s251_s22 = int_to_ptr.vmem [resolvable:$true] %s250_s22 }
  0x3d   :  { %v181_v48 = vld [vmem:[#allocation2 + $0x28] sm:$0xff]  ;;  %v164_v57 = vld [vmem:[%s567_s0 + $0x20] sm:$0xff]  ;;  %v183_v60 = vld [vmem:[#allocation2 + $0x38] sm:$0xff]  ;;  %s328_s23 = scalar_lea.vmem %s251_s22, 2048  ;;  %p333_p3 = scmp.lt.s32.totalorder %s251_s22, %s251_s22 }
  0x3e   :  { %v141_v24 = vsub.s32 0, %v140_v23  ;;  %v165_v56 = vld [vmem:[%s567_s0 + $0x28] sm:$0xff]  ;;  %v182_v62 = vld [vmem:[#allocation2 + $0x30] sm:$0xff]  ;;  %v167_v4 = vld [vmem:[%s567_s0 + $0x38] sm:$0xff]  ;;  %p329_p2 = scmp.ne.s32.totalorder %s251_s22, %s328_s23  ;;  %p334_p4 = scmp.lt.s32.totalorder %s328_s23, %s328_s23 }
  0x3f   :  { %v166_v5 = vld [vmem:[%s567_s0 + $0x30] sm:$0xff]  ;;  %v185_v8 = vld [vmem:[#allocation2 + $0x48] sm:$0xff]  ;;  %v184_v10 = vld [vmem:[#allocation2 + $0x40] sm:$0xff] }
  0x40   :  { %v486_v25 = vrot.slane %v41_v17, %v141_v24  ;;  %v169_v16 = vld [vmem:[%s567_s0 + $0x48] sm:$0xff]  ;;  %v168_v17 = vld [vmem:[%s567_s0 + $0x40] sm:$0xff]  ;;  %v187_v20 = vld [vmem:[#allocation2 + $0x58] sm:$0xff]  ;;  %p335_p5 = por %p334_p4, %p333_p3 }
  0x41   :  { %v186_v22 = vld [vmem:[#allocation2 + $0x50] sm:$0xff] }
  0x42   :  { %p336_p6 = pnand %p335_p5, %p329_p2 }
  0x95   :  { %v71_v27 = vpop.permute.xlu1 %70  ;;  %v61_v29 = vpop.permute.xlu0 %60 }
  0x96   :  { %v146_v30 = vmul.f32 %v486_v25, %v71_v27  ;;  %v144_v31 = vmul.f32 %v486_v25, %v61_v29  ;;  %v171_v29 = vld [vmem:[%s567_s0 + $0x58] sm:$0xff] }
  0x98   :  { %v194_v34 = vmul.f32 %v178_v26, %v146_v30  ;;  %v192_v35 = vmul.f32 %v176_v28, %v144_v31  ;;  %v170_v30 = vld [vmem:[%s567_s0 + $0x50] sm:$0xff] }
  0x99   :  { %v76_v37 = vpop.permute.xlu1 %75  ;;  %v66_v39 = vpop.permute.xlu0 %65 }
  0x9a   :  { %v210_v40 = vadd.f32 %v194_v34, %v162_v32  ;;  %v208_v41 = vadd.f32 %v192_v35, %v160_v33  ;;  %v147_v42 = vmul.f32 %v486_v25, %v76_v37  ;;  %v145_v43 = vmul.f32 %v486_v25, %v66_v39  ;;  %v189_v33 = vld [vmem:[#allocation2 + $0x68] sm:$0xff]  ;;  %v188_v35 = vld [vmem:[#allocation2 + $0x60] sm:$0xff] }
  0x9c   :  { %226 = vst [vmem:[#allocation5 + $0x10] sm:$0xff] %v210_v40  ;;  %224 = vst [vmem:[#allocation5] sm:$0xff] %v208_v41  ;;  %v195_v46 = vmul.f32 %v179_v36, %v147_v42  ;;  %v193_v47 = vmul.f32 %v177_v38, %v145_v43  ;;  %v173_v41 = vld [vmem:[%s567_s0 + $0x68] sm:$0xff]  ;;  %v172_v42 = vld [vmem:[%s567_s0 + $0x60] sm:$0xff] }
  0x9d   :  { %v86_v49 = vpop.permute.xlu1 %85  ;;  %v81_v51 = vpop.permute.xlu0 %80 }
  0x9e   :  { %v211_v52 = vadd.f32 %v195_v46, %v163_v44  ;;  %v209_v53 = vadd.f32 %v193_v47, %v161_v45  ;;  %v149_v54 = vmul.f32 %v486_v25, %v86_v49  ;;  %v148_v55 = vmul.f32 %v486_v25, %v81_v51  ;;  %v191_v45 = vld [vmem:[#allocation2 + $0x78] sm:$0xff]  ;;  %v190_v47 = vld [vmem:[#allocation2 + $0x70] sm:$0xff] }
  0xa0   :  { %227 = vst [vmem:[#allocation5 + $0x18] sm:$0xff] %v211_v52  ;;  %225 = vst [vmem:[#allocation5 + $0x8] sm:$0xff] %v209_v53  ;;  %v197_v58 = vmul.f32 %v181_v48, %v149_v54  ;;  %v196_v59 = vmul.f32 %v180_v50, %v148_v55  ;;  %v175_v53 = vld [vmem:[%s567_s0 + $0x78] sm:$0xff]  ;;  %v174_v54 = vld [vmem:[%s567_s0 + $0x70] sm:$0xff] }
  0xa1   :  { %v96_v61 = vpop.permute.xlu1 %95  ;;  %v91_v63 = vpop.permute.xlu0 %90 }
  0xa2   :  { %v213_v0 = vadd.f32 %v197_v58, %v165_v56  ;;  %v212_v1 = vadd.f32 %v196_v59, %v164_v57  ;;  %v151_v2 = vmul.f32 %v486_v25, %v96_v61  ;;  %v150_v3 = vmul.f32 %v486_v25, %v91_v63 }
  0xa4   :  { %229 = vst [vmem:[#allocation5 + $0x28] sm:$0xff] %v213_v0  ;;  %228 = vst [vmem:[#allocation5 + $0x20] sm:$0xff] %v212_v1  ;;  %v199_v6 = vmul.f32 %v183_v60, %v151_v2  ;;  %v198_v7 = vmul.f32 %v182_v62, %v150_v3 }
  0xa5   :  { %v106_v9 = vpop.permute.xlu1 %105  ;;  %v101_v11 = vpop.permute.xlu0 %100 }
  0xa6   :  { %v215_v12 = vadd.f32 %v199_v6, %v167_v4  ;;  %v214_v13 = vadd.f32 %v198_v7, %v166_v5  ;;  %v153_v14 = vmul.f32 %v486_v25, %v106_v9  ;;  %v152_v15 = vmul.f32 %v486_v25, %v101_v11 }
  0xa8   :  { %231 = vst [vmem:[#allocation5 + $0x38] sm:$0xff] %v215_v12  ;;  %230 = vst [vmem:[#allocation5 + $0x30] sm:$0xff] %v214_v13  ;;  %v201_v18 = vmul.f32 %v185_v8, %v153_v14  ;;  %v200_v19 = vmul.f32 %v184_v10, %v152_v15 }
  0xa9   :  { %v116_v21 = vpop.permute.xlu1 %115  ;;  %v111_v23 = vpop.permute.xlu0 %110 }
  0xaa   :  { %v217_v24 = vadd.f32 %v201_v18, %v169_v16  ;;  %v216_v26 = vadd.f32 %v200_v19, %v168_v17  ;;  %v155_v27 = vmul.f32 %v486_v25, %v116_v21  ;;  %v154_v28 = vmul.f32 %v486_v25, %v111_v23 }
  0xac   :  { %233 = vst [vmem:[#allocation5 + $0x48] sm:$0xff] %v217_v24  ;;  %232 = vst [vmem:[#allocation5 + $0x40] sm:$0xff] %v216_v26  ;;  %v203_v31 = vmul.f32 %v187_v20, %v155_v27  ;;  %v202_v32 = vmul.f32 %v186_v22, %v154_v28 }
  0xad   :  { %v126_v34 = vpop.permute.xlu1 %125  ;;  %v121_v36 = vpop.permute.xlu0 %120 }
  0xae   :  { %v219_v37 = vadd.f32 %v203_v31, %v171_v29  ;;  %v218_v38 = vadd.f32 %v202_v32, %v170_v30  ;;  %v157_v39 = vmul.f32 %v486_v25, %v126_v34  ;;  %v156_v40 = vmul.f32 %v486_v25, %v121_v36 }
  0xb0   :  { %235 = vst [vmem:[#allocation5 + $0x58] sm:$0xff] %v219_v37  ;;  %234 = vst [vmem:[#allocation5 + $0x50] sm:$0xff] %v218_v38  ;;  %v205_v43 = vmul.f32 %v189_v33, %v157_v39  ;;  %v204_v44 = vmul.f32 %v188_v35, %v156_v40 }
  0xb1   :  { %v136_v46 = vpop.permute.xlu1 %135  ;;  %v131_v48 = vpop.permute.xlu0 %130 }
  0xb2   :  { %v221_v49 = vadd.f32 %v205_v43, %v173_v41  ;;  %v220_v50 = vadd.f32 %v204_v44, %v172_v42  ;;  %v159_v51 = vmul.f32 %v486_v25, %v136_v46  ;;  %v158_v52 = vmul.f32 %v486_v25, %v131_v48 }
  0xb4   :  { %237 = vst [vmem:[#allocation5 + $0x68] sm:$0xff] %v221_v49  ;;  %236 = vst [vmem:[#allocation5 + $0x60] sm:$0xff] %v220_v50  ;;  %v207_v55 = vmul.f32 %v191_v45, %v159_v51  ;;  %v206_v56 = vmul.f32 %v190_v47, %v158_v52 }
  0xb6   :  { %v223_v57 = vadd.f32 %v207_v55, %v175_v53  ;;  %v222_v58 = vadd.f32 %v206_v56, %v174_v54 }
  0xb8   :  { %239 = vst [vmem:[#allocation5 + $0x78] sm:$0xff] %v223_v57  ;;  %238 = vst [vmem:[#allocation5 + $0x70] sm:$0xff] %v222_v58 }
  0xb9   :  { %339 = shalt.err (!%p336_p6)
}
  0xba   :  { %s340_s25 = scalar_lea.hbm %s573_s6, 2048 }
  0xbb   :  { %p341_p7 = scmp.ne.s32.totalorder %s573_s6, %s340_s25  ;;  %p344_p8 = scmp.lt.u32.totalorder %s340_s25, %s573_s6 }
  0xbd   :  { %p346_p9 = pnand %p344_p8, %p341_p7 }
  0xbf   :  { %349 = shalt.err (!%p346_p9)
}
  0xc0   :  { %256 = dma.vmem_to_hbm [thread:$0]  %s251_s22, 2048, %s573_s6, [#allocation4], %s357_s11, %s357_s11, %s358_s12  }
  0xc1   :  { %352 = dma.done.wait [#allocation4], 2048  }
  0xc2   :  { %353 = vsyncadd [#allocation4], 4294965248 }
  0xc3   :  { %354 = dma.done.wait [#allocation7], 16  }
  0xc4   :  { %355 = vsyncadd [#allocation7], 4294967280 }
  0xc5   :  { %273 = vsyncpa [#allocation3], 1 }
  0xc6   :  { %274 = vsyncpa [#allocation4], 1 }
  0xc7   :  { %275 = vsyncpa [#allocation7], 1 }

</bundles_post_ra>
